<compile_context>
chip_gen: v7x
topology: tpu7x:2x2x1
jax: 0.10.0
libtpu: 0.0.40
codegen_flags: <defaults>
</compile_context>

<pallas_src>
import functools

import jax
import jax.numpy as jnp
from jax import lax
from jax.experimental import pallas as pl
from jax.experimental.pallas import tpu as pltpu

KERNEL_SIZE = 3   # matches nn.Conv1d(kernel_size=3, padding=1)
BN_EPS = 1e-5
LANES = 128


def _round_up(v, m):
    return (v + m - 1) // m * m


def dense_block_kernel(x_ref, w_ref, bias_ref, out_ref, *,
                       c_in, k, num_layers, seq_len, lpad, mm_dtype):
    """Whole DenseBlock for one batch element, computed in-place in out_ref.

    x_ref   : (1, C_in, L)               input sequence
    w_ref   : (num_layers, 3, k, c_max)  BN-folded per-tap conv weights
                                         (mm_dtype, zero-padded on channel axis)
    bias_ref: (num_layers, k, 1)         BN-folded biases (f32)
    out_ref : (1, C_total, LPAD)         growing feature map == final output.
                                         Data in columns [1, 1+L); zero conv
                                         halo in column 0 and columns [1+L, LPAD).
    """
    L = seq_len
    halo_r = lpad - L - 1            # >= 1 by construction

    # Seed rows [0, c_in) with the input framed by the zero halo / lane pad.
    # One full-width lane-aligned store (also zeroes all pad columns; no
    # separate zero-init pass, no masked lane-offset-1 store).
    x0 = x_ref[0].astype(jnp.float32)                              # (C_in, L)
    out_ref[0, 0:c_in, :] = jnp.concatenate(
        [jnp.zeros((c_in, 1), jnp.float32), x0,
         jnp.zeros((c_in, halo_r), jnp.float32)], axis=-1).astype(out_ref.dtype)

    for i in range(num_layers):                  # static, unrolled layer loop
        c_i = c_in + i * k
        # Read the resident feature map once per layer; cast operands to bf16
        # (f32 accumulation below).
        xp = out_ref[0, 0:c_i, :].astype(mm_dtype)                 # (c_i, LPAD)
        # Conv1d(k=3, pad=1) as three accumulating MXU pushes:
        #   out[:, t] = sum_j W[:, :, j] @ x_pad[:, t + j]
        acc = jnp.dot(w_ref[i, 0, :, 0:c_i], xp[:, 0:L],
                      preferred_element_type=jnp.float32)
        acc += jnp.dot(w_ref[i, 1, :, 0:c_i], xp[:, 1:1 + L],
                       preferred_element_type=jnp.float32)
        acc += jnp.dot(w_ref[i, 2, :, 0:c_i], xp[:, 2:2 + L],
                       preferred_element_type=jnp.float32)         # (k, L) f32
        y = jnp.maximum(acc + bias_ref[i], 0.0)   # folded BN bias + ReLU (f32)
        # Dropout: identity in eval mode.
        # Append the k new channels: one full-width lane-aligned store with the
        # zero halo / pad columns rebuilt for free.
        out_ref[0, c_i:c_i + k, :] = jnp.concatenate(
            [jnp.zeros((k, 1), jnp.float32), y,
             jnp.zeros((k, halo_r), jnp.float32)], axis=-1).astype(out_ref.dtype)


def dense_block_pallas(x, params, *, mm_dtype=jnp.bfloat16):
    """x: (N, C_in, L) -> (N, C_in + num_layers*k, L). Eval-mode DenseBlock."""
    N, C_in, L = x.shape
    num_layers = len(params)
    k = params[0]["conv_w"].shape[0]
    C_total = C_in + num_layers * k
    c_max = C_in + (num_layers - 1) * k
    LPAD = _round_up(L + 2, LANES)

    # Fold conv bias + eval-mode BatchNorm into per-tap weights / per-channel
    # bias (folding done in f32; only matmul operands are cast to mm_dtype).
    # All layers' weights packed into ONE zero-padded resident array.
    w_all = jnp.zeros((num_layers, KERNEL_SIZE, k, c_max), mm_dtype)
    bs = []
    for i, p in enumerate(params):
        c_i = C_in + i * k
        scale = p["gamma"] * lax.rsqrt(p["run_var"] + BN_EPS)        # (k,)
        bias = p["beta"] + (p["conv_b"] - p["run_mean"]) * scale     # (k,)
        w = p["conv_w"] * scale[:, None, None]                       # (k, c_i, K)
        w_taps = jnp.transpose(w, (2, 0, 1)).astype(mm_dtype)        # (K, k, c_i)
        w_all = w_all.at[i, :, :, :c_i].set(w_taps)
        bs.append(bias)
    bias_all = jnp.stack(bs)[:, :, None]                             # (nl, k, 1)

    kernel = functools.partial(
        dense_block_kernel, c_in=C_in, k=k, num_layers=num_layers,
        seq_len=L, lpad=LPAD, mm_dtype=mm_dtype)

    # Explicit VMEM budget: double-buffered in/out blocks + resident weights +
    # per-layer temporaries, with headroom (important on v7x 64 MiB / v5e 16 MiB
    # default scoped limits).
    out_bytes = C_total * LPAD * x.dtype.itemsize
    in_bytes = C_in * L * x.dtype.itemsize
    const_bytes = w_all.size * jnp.dtype(mm_dtype).itemsize + bias_all.size * 4
    tmp_bytes = 4 * c_max * LPAD * 4
    need = 2 * (out_bytes + in_bytes) + const_bytes + tmp_bytes + (1 << 20)
    vmem_limit = int(max(min(2 * need, 64 << 20), need))

    out_padded = pl.pallas_call(
        kernel,
        out_shape=jax.ShapeDtypeStruct((N, C_total, LPAD), x.dtype),
        grid=(N,),
        in_specs=[
            pl.BlockSpec((1, C_in, L), lambda n: (n, 0, 0)),
            # Tiny folded weights / biases: constant index maps -> one DMA,
            # resident in VMEM for the whole kernel.
            pl.BlockSpec((num_layers, KERNEL_SIZE, k, c_max),
                         lambda n: (0, 0, 0, 0)),
            pl.BlockSpec((num_layers, k, 1), lambda n: (0, 0, 0)),
        ],
        out_specs=pl.BlockSpec((1, C_total, LPAD), lambda n: (n, 0, 0)),
        compiler_params=pltpu.CompilerParams(
            dimension_semantics=("parallel",),
            vmem_limit_bytes=vmem_limit),
    )(x, w_all, bias_all)

    # Trim the conv halo / lane padding.
    # TODO(synk): at realistic sizes let the consumer read the padded layout
    #             (or fuse the next op) so this slice doesn't copy the tensor.
    return out_padded[:, :, 1:1 + L]


dense_block_forward = jax.jit(
    functools.partial(dense_block_pallas, mm_dtype=jnp.bfloat16))
dense_block_forward_f32 = jax.jit(
    functools.partial(dense_block_pallas, mm_dtype=jnp.float32))


def init_dense_block_params(key, c_in, k, num_layers):
    """Deterministic parameters for every DenseLayer in the block."""
    params = []
    for i in range(num_layers):
        cin_i = c_in + i * k
        keys = jax.random.split(jax.random.fold_in(key, i), 6)
        conv_w = 0.1 * jax.random.normal(keys[0], (k, cin_i, KERNEL_SIZE),
                                         jnp.float32)        # (C_out, C_in, K)
        conv_b = 0.1 * jax.random.normal(keys[1], (k,), jnp.float32)
        gamma = 1.0 + 0.1 * jax.random.normal(keys[2], (k,), jnp.float32)
        beta = 0.1 * jax.random.normal(keys[3], (k,), jnp.float32)
        run_mean = 0.1 * jax.random.normal(keys[4], (k,), jnp.float32)
        run_var = jnp.abs(jax.random.normal(keys[5], (k,), jnp.float32)) + 0.5
        params.append(dict(conv_w=conv_w, conv_b=conv_b, gamma=gamma,
                           beta=beta, run_mean=run_mean, run_var=run_var))
    return params


def dense_block_reference(x, params, num_layers):
    """Pure-JAX eval-mode reference (lax conv), f32 throughout."""
    seq = x
    for i in range(num_layers):
        p = params[i]
        y = lax.conv_general_dilated(
            seq, p["conv_w"], window_strides=(1,), padding=((1, 1),),
            dimension_numbers=("NCH", "OIH", "NCH"),
        ) + p["conv_b"][None, :, None]
        y = (y - p["run_mean"][None, :, None]) / jnp.sqrt(
            p["run_var"][None, :, None] + BN_EPS)
        y = y * p["gamma"][None, :, None] + p["beta"][None, :, None]
        y = jnp.maximum(y, 0.0)
        seq = jnp.concatenate([seq, y], axis=1)
    return seq


def dense_block_reference_folded(x, params, num_layers, mm_dtype):
    """Reference with BN folded and matmul operands cast to mm_dtype
    (mirrors the kernel's bf16-operand / f32-accumulation numerics)."""
    seq = x.astype(jnp.float32)
    for i in range(num_layers):
        p = params[i]
        scale = p["gamma"] * lax.rsqrt(p["run_var"] + BN_EPS)
        bias = p["beta"] + (p["conv_b"] - p["run_mean"]) * scale
        w = (p["conv_w"] * scale[:, None, None]).astype(mm_dtype)
        y = lax.conv_general_dilated(
            seq.astype(mm_dtype), w, window_strides=(1,), padding=((1, 1),),
            dimension_numbers=("NCH", "OIH", "NCH"),
            preferred_element_type=jnp.float32)
        y = jnp.maximum(y + bias[None, :, None], 0.0)
        seq = jnp.concatenate([seq, y], axis=1)
    return seq


if __name__ == "__main__":
    # DenseBlock(c_in=4, k=4, num_layers=3); input (N=2, C=4, L=16)
    N, C_IN, L = 2, 4, 16
    K_GROWTH, NUM_LAYERS = 4, 3

    key = jax.random.PRNGKey(0)
    kx, kp = jax.random.split(key)
    x = jax.random.normal(kx, (N, C_IN, L), jnp.float32)
    params = init_dense_block_params(kp, C_IN, K_GROWTH, NUM_LAYERS)
    c_total = C_IN + NUM_LAYERS * K_GROWTH

    # Exact-math check: f32 matmul operands vs the plain eval-mode reference.
    out_f32 = jax.block_until_ready(dense_block_forward_f32(x, params))
    ref_f32 = dense_block_reference(x, params, NUM_LAYERS)
    assert out_f32.shape == (N, c_total, L), out_f32.shape
    assert jnp.allclose(out_f32, ref_f32, atol=1e-4, rtol=1e-4), "f32 mismatch"

    # Production path: bf16 matmul operands (f32 accumulation / epilogue),
    # checked against a reference with matching operand precision.
    out_bf16 = jax.block_until_ready(dense_block_forward(x, params))
    ref_bf16 = dense_block_reference_folded(x, params, NUM_LAYERS, jnp.bfloat16)
    assert out_bf16.shape == (N, c_total, L), out_bf16.shape
    assert jnp.allclose(out_bf16, ref_bf16, atol=2e-3, rtol=2e-3), "bf16 mismatch"

    print("KERNEL_OK")
</pallas_src>

<mosaic_0001>
module attributes {stable_mosaic.version = 11 : i64} {
  func.func @dense_block_kernel(%arg0: i32, %arg1: memref<1x4x16xf32, #tpu.memory_space<vmem>>, %arg2: memref<3x3x4x12xf32, #tpu.memory_space<vmem>>, %arg3: memref<3x4x1xf32, #tpu.memory_space<vmem>>, %arg4: memref<1x16x128xf32, #tpu.memory_space<vmem>>) attributes {dimension_semantics = [#tpu.dimension_semantics<parallel>], iteration_bounds = array<i64: 2>, scalar_prefetch = 0 : i64, scratch_operands = 0 : i64, tpu.core_type = #tpu.core_type<tc>, window_params = [{transform_indices = @transform_0, window_bounds = array<i64: 1, 4, 16>}, {pipeline_mode = #tpu.pipeline_mode<synchronous>, transform_indices = @transform_1, window_bounds = array<i64: 3, 3, 4, 12>}, {pipeline_mode = #tpu.pipeline_mode<synchronous>, transform_indices = @transform_2, window_bounds = array<i64: 3, 4, 1>}, {transform_indices = @transform_3, window_bounds = array<i64: 1, 16, 128>}]} {
    %c0 = arith.constant 0 : index
    %c0_0 = arith.constant 0 : index
    %c0_1 = arith.constant 0 : index
    %0 = vector.load %arg1[%c0, %c0_0, %c0_1] : memref<1x4x16xf32, #tpu.memory_space<vmem>>, vector<1x4x16xf32>
    %1 = vector.shape_cast %0 : vector<1x4x16xf32> to vector<4x16xf32>
    %cst = arith.constant 0.000000e+00 : f32
    %2 = vector.broadcast %cst : f32 to vector<4x1xf32>
    %cst_2 = arith.constant 0.000000e+00 : f32
    %3 = vector.broadcast %cst_2 : f32 to vector<4x111xf32>
    %4 = tpu.concatenate %2, %1, %3 in 1 : vector<4x1xf32>, vector<4x16xf32>, vector<4x111xf32> -> vector<4x128xf32>
    %c0_3 = arith.constant 0 : index
    %c0_4 = arith.constant 0 : index
    %c0_5 = arith.constant 0 : index
    %5 = vector.load %arg4[%c0_3, %c0_4, %c0_5] : memref<1x16x128xf32, #tpu.memory_space<vmem>>, vector<1x4x128xf32>
    %6 = vector.shape_cast %5 : vector<1x4x128xf32> to vector<4x128xf32>
    %7 = vector.shape_cast %4 : vector<4x128xf32> to vector<1x4x128xf32>
    tpu.vector_store %arg4[%c0_3, %c0_4, %c0_5], %7 {strides = array<i32>} : memref<1x16x128xf32, #tpu.memory_space<vmem>>, vector<1x4x128xf32>,
    %c0_6 = arith.constant 0 : index
    %c0_7 = arith.constant 0 : index
    %c0_8 = arith.constant 0 : index
    %8 = vector.load %arg4[%c0_6, %c0_7, %c0_8] : memref<1x16x128xf32, #tpu.memory_space<vmem>>, vector<1x4x128xf32>
    %9 = vector.shape_cast %8 : vector<1x4x128xf32> to vector<4x128xf32>
    %c0_9 = arith.constant 0 : index
    %c0_10 = arith.constant 0 : index
    %c0_11 = arith.constant 0 : index
    %c0_12 = arith.constant 0 : index
    %10 = vector.load %arg2[%c0_9, %c0_10, %c0_11, %c0_12] : memref<3x3x4x12xf32, #tpu.memory_space<vmem>>, vector<1x1x4x4xf32>
    %11 = vector.shape_cast %10 : vector<1x1x4x4xf32> to vector<4x4xf32>
    %12 = vector.extract_strided_slice %9 {offsets = [0, 0], sizes = [4, 16], strides = [1, 1]} : vector<4x128xf32> to vector<4x16xf32>
    %cst_13 = arith.constant dense<0.000000e+00> : vector<4x16xf32>
    %13 = tpu.matmul %11, %12, %cst_13 {dimension_numbers = #tpu.dot_dimension_numbers<[1], [0], [0], [1], [0, 0, 1, 1], [], []>} : vector<4x4xf32>, vector<4x16xf32>, vector<4x16xf32> -> vector<4x16xf32>
    %c0_14 = arith.constant 0 : index
    %c1 = arith.constant 1 : index
    %c0_15 = arith.constant 0 : index
    %c0_16 = arith.constant 0 : index
    %14 = vector.load %arg2[%c0_14, %c1, %c0_15, %c0_16] : memref<3x3x4x12xf32, #tpu.memory_space<vmem>>, vector<1x1x4x4xf32>
    %15 = vector.shape_cast %14 : vector<1x1x4x4xf32> to vector<4x4xf32>
    %16 = vector.extract_strided_slice %9 {offsets = [0, 1], sizes = [4, 16], strides = [1, 1]} : vector<4x128xf32> to vector<4x16xf32>
    %cst_17 = arith.constant dense<0.000000e+00> : vector<4x16xf32>
    %17 = tpu.matmul %15, %16, %cst_17 {dimension_numbers = #tpu.dot_dimension_numbers<[1], [0], [0], [1], [0, 0, 1, 1], [], []>} : vector<4x4xf32>, vector<4x16xf32>, vector<4x16xf32> -> vector<4x16xf32>
    %18 = arith.addf %13, %17 : vector<4x16xf32>
    %c0_18 = arith.constant 0 : index
    %c2 = arith.constant 2 : index
    %c0_19 = arith.constant 0 : index
    %c0_20 = arith.constant 0 : index
    %19 = vector.load %arg2[%c0_18, %c2, %c0_19, %c0_20] : memref<3x3x4x12xf32, #tpu.memory_space<vmem>>, vector<1x1x4x4xf32>
    %20 = vector.shape_cast %19 : vector<1x1x4x4xf32> to vector<4x4xf32>
    %21 = vector.extract_strided_slice %9 {offsets = [0, 2], sizes = [4, 16], strides = [1, 1]} : vector<4x128xf32> to vector<4x16xf32>
    %cst_21 = arith.constant dense<0.000000e+00> : vector<4x16xf32>
    %22 = tpu.matmul %20, %21, %cst_21 {dimension_numbers = #tpu.dot_dimension_numbers<[1], [0], [0], [1], [0, 0, 1, 1], [], []>} : vector<4x4xf32>, vector<4x16xf32>, vector<4x16xf32> -> vector<4x16xf32>
    %23 = arith.addf %18, %22 : vector<4x16xf32>
    %c0_22 = arith.constant 0 : index
    %c0_23 = arith.constant 0 : index
    %c0_24 = arith.constant 0 : index
    %24 = vector.load %arg3[%c0_22, %c0_23, %c0_24] : memref<3x4x1xf32, #tpu.memory_space<vmem>>, vector<1x4x1xf32>
    %25 = vector.shape_cast %24 : vector<1x4x1xf32> to vector<4x1xf32>
    %26 = vector.broadcast %25 : vector<4x1xf32> to vector<4x16xf32>
    %27 = arith.addf %23, %26 : vector<4x16xf32>
    %cst_25 = arith.constant 0.000000e+00 : f32
    %28 = vector.broadcast %cst_25 : f32 to vector<4x16xf32>
    %29 = arith.maximumf %27, %28 : vector<4x16xf32>
    %cst_26 = arith.constant 0.000000e+00 : f32
    %30 = vector.broadcast %cst_26 : f32 to vector<4x1xf32>
    %cst_27 = arith.constant 0.000000e+00 : f32
    %31 = vector.broadcast %cst_27 : f32 to vector<4x111xf32>
    %32 = tpu.concatenate %30, %29, %31 in 1 : vector<4x1xf32>, vector<4x16xf32>, vector<4x111xf32> -> vector<4x128xf32>
    %c0_28 = arith.constant 0 : index
    %c4 = arith.constant 4 : index
    %c0_29 = arith.constant 0 : index
    %33 = vector.load %arg4[%c0_28, %c4, %c0_29] : memref<1x16x128xf32, #tpu.memory_space<vmem>>, vector<1x4x128xf32>
    %34 = vector.shape_cast %33 : vector<1x4x128xf32> to vector<4x128xf32>
    %35 = vector.shape_cast %32 : vector<4x128xf32> to vector<1x4x128xf32>
    tpu.vector_store %arg4[%c0_28, %c4, %c0_29], %35 {strides = array<i32>} : memref<1x16x128xf32, #tpu.memory_space<vmem>>, vector<1x4x128xf32>,
    %c0_30 = arith.constant 0 : index
    %c0_31 = arith.constant 0 : index
    %c0_32 = arith.constant 0 : index
    %36 = vector.load %arg4[%c0_30, %c0_31, %c0_32] : memref<1x16x128xf32, #tpu.memory_space<vmem>>, vector<1x8x128xf32>
    %37 = vector.shape_cast %36 : vector<1x8x128xf32> to vector<8x128xf32>
    %c1_33 = arith.constant 1 : index
    %c0_34 = arith.constant 0 : index
    %c0_35 = arith.constant 0 : index
    %c0_36 = arith.constant 0 : index
    %38 = vector.load %arg2[%c1_33, %c0_34, %c0_35, %c0_36] : memref<3x3x4x12xf32, #tpu.memory_space<vmem>>, vector<1x1x4x8xf32>
    %39 = vector.shape_cast %38 : vector<1x1x4x8xf32> to vector<4x8xf32>
    %40 = vector.extract_strided_slice %37 {offsets = [0, 0], sizes = [8, 16], strides = [1, 1]} : vector<8x128xf32> to vector<8x16xf32>
    %cst_37 = arith.constant dense<0.000000e+00> : vector<4x16xf32>
    %41 = tpu.matmul %39, %40, %cst_37 {dimension_numbers = #tpu.dot_dimension_numbers<[1], [0], [0], [1], [0, 0, 1, 1], [], []>} : vector<4x8xf32>, vector<8x16xf32>, vector<4x16xf32> -> vector<4x16xf32>
    %c1_38 = arith.constant 1 : index
    %c1_39 = arith.constant 1 : index
    %c0_40 = arith.constant 0 : index
    %c0_41 = arith.constant 0 : index
    %42 = vector.load %arg2[%c1_38, %c1_39, %c0_40, %c0_41] : memref<3x3x4x12xf32, #tpu.memory_space<vmem>>, vector<1x1x4x8xf32>
    %43 = vector.shape_cast %42 : vector<1x1x4x8xf32> to vector<4x8xf32>
    %44 = vector.extract_strided_slice %37 {offsets = [0, 1], sizes = [8, 16], strides = [1, 1]} : vector<8x128xf32> to vector<8x16xf32>
    %cst_42 = arith.constant dense<0.000000e+00> : vector<4x16xf32>
    %45 = tpu.matmul %43, %44, %cst_42 {dimension_numbers = #tpu.dot_dimension_numbers<[1], [0], [0], [1], [0, 0, 1, 1], [], []>} : vector<4x8xf32>, vector<8x16xf32>, vector<4x16xf32> -> vector<4x16xf32>
    %46 = arith.addf %41, %45 : vector<4x16xf32>
    %c1_43 = arith.constant 1 : index
    %c2_44 = arith.constant 2 : index
    %c0_45 = arith.constant 0 : index
    %c0_46 = arith.constant 0 : index
    %47 = vector.load %arg2[%c1_43, %c2_44, %c0_45, %c0_46] : memref<3x3x4x12xf32, #tpu.memory_space<vmem>>, vector<1x1x4x8xf32>
    %48 = vector.shape_cast %47 : vector<1x1x4x8xf32> to vector<4x8xf32>
    %49 = vector.extract_strided_slice %37 {offsets = [0, 2], sizes = [8, 16], strides = [1, 1]} : vector<8x128xf32> to vector<8x16xf32>
    %cst_47 = arith.constant dense<0.000000e+00> : vector<4x16xf32>
    %50 = tpu.matmul %48, %49, %cst_47 {dimension_numbers = #tpu.dot_dimension_numbers<[1], [0], [0], [1], [0, 0, 1, 1], [], []>} : vector<4x8xf32>, vector<8x16xf32>, vector<4x16xf32> -> vector<4x16xf32>
    %51 = arith.addf %46, %50 : vector<4x16xf32>
    %c1_48 = arith.constant 1 : index
    %c0_49 = arith.constant 0 : index
    %c0_50 = arith.constant 0 : index
    %52 = vector.load %arg3[%c1_48, %c0_49, %c0_50] : memref<3x4x1xf32, #tpu.memory_space<vmem>>, vector<1x4x1xf32>
    %53 = vector.shape_cast %52 : vector<1x4x1xf32> to vector<4x1xf32>
    %54 = vector.broadcast %53 : vector<4x1xf32> to vector<4x16xf32>
    %55 = arith.addf %51, %54 : vector<4x16xf32>
    %cst_51 = arith.constant 0.000000e+00 : f32
    %56 = vector.broadcast %cst_51 : f32 to vector<4x16xf32>
    %57 = arith.maximumf %55, %56 : vector<4x16xf32>
    %cst_52 = arith.constant 0.000000e+00 : f32
    %58 = vector.broadcast %cst_52 : f32 to vector<4x1xf32>
    %cst_53 = arith.constant 0.000000e+00 : f32
    %59 = vector.broadcast %cst_53 : f32 to vector<4x111xf32>
    %60 = tpu.concatenate %58, %57, %59 in 1 : vector<4x1xf32>, vector<4x16xf32>, vector<4x111xf32> -> vector<4x128xf32>
    %c0_54 = arith.constant 0 : index
    %c8 = arith.constant 8 : index
    %c0_55 = arith.constant 0 : index
    %61 = vector.load %arg4[%c0_54, %c8, %c0_55] : memref<1x16x128xf32, #tpu.memory_space<vmem>>, vector<1x4x128xf32>
    %62 = vector.shape_cast %61 : vector<1x4x128xf32> to vector<4x128xf32>
    %63 = vector.shape_cast %60 : vector<4x128xf32> to vector<1x4x128xf32>
    tpu.vector_store %arg4[%c0_54, %c8, %c0_55], %63 {strides = array<i32>} : memref<1x16x128xf32, #tpu.memory_space<vmem>>, vector<1x4x128xf32>,
    %c0_56 = arith.constant 0 : index
    %c0_57 = arith.constant 0 : index
    %c0_58 = arith.constant 0 : index
    %64 = vector.load %arg4[%c0_56, %c0_57, %c0_58] : memref<1x16x128xf32, #tpu.memory_space<vmem>>, vector<1x12x128xf32>
    %65 = vector.shape_cast %64 : vector<1x12x128xf32> to vector<12x128xf32>
    %c2_59 = arith.constant 2 : index
    %c0_60 = arith.constant 0 : index
    %c0_61 = arith.constant 0 : index
    %c0_62 = arith.constant 0 : index
    %66 = vector.load %arg2[%c2_59, %c0_60, %c0_61, %c0_62] : memref<3x3x4x12xf32, #tpu.memory_space<vmem>>, vector<1x1x4x12xf32>
    %67 = vector.shape_cast %66 : vector<1x1x4x12xf32> to vector<4x12xf32>
    %68 = vector.extract_strided_slice %65 {offsets = [0, 0], sizes = [12, 16], strides = [1, 1]} : vector<12x128xf32> to vector<12x16xf32>
    %cst_63 = arith.constant dense<0.000000e+00> : vector<4x16xf32>
    %69 = tpu.matmul %67, %68, %cst_63 {dimension_numbers = #tpu.dot_dimension_numbers<[1], [0], [0], [1], [0, 0, 1, 1], [], []>} : vector<4x12xf32>, vector<12x16xf32>, vector<4x16xf32> -> vector<4x16xf32>
    %c2_64 = arith.constant 2 : index
    %c1_65 = arith.constant 1 : index
    %c0_66 = arith.constant 0 : index
    %c0_67 = arith.constant 0 : index
    %70 = vector.load %arg2[%c2_64, %c1_65, %c0_66, %c0_67] : memref<3x3x4x12xf32, #tpu.memory_space<vmem>>, vector<1x1x4x12xf32>
    %71 = vector.shape_cast %70 : vector<1x1x4x12xf32> to vector<4x12xf32>
    %72 = vector.extract_strided_slice %65 {offsets = [0, 1], sizes = [12, 16], strides = [1, 1]} : vector<12x128xf32> to vector<12x16xf32>
    %cst_68 = arith.constant dense<0.000000e+00> : vector<4x16xf32>
    %73 = tpu.matmul %71, %72, %cst_68 {dimension_numbers = #tpu.dot_dimension_numbers<[1], [0], [0], [1], [0, 0, 1, 1], [], []>} : vector<4x12xf32>, vector<12x16xf32>, vector<4x16xf32> -> vector<4x16xf32>
    %74 = arith.addf %69, %73 : vector<4x16xf32>
    %c2_69 = arith.constant 2 : index
    %c2_70 = arith.constant 2 : index
    %c0_71 = arith.constant 0 : index
    %c0_72 = arith.constant 0 : index
    %75 = vector.load %arg2[%c2_69, %c2_70, %c0_71, %c0_72] : memref<3x3x4x12xf32, #tpu.memory_space<vmem>>, vector<1x1x4x12xf32>
    %76 = vector.shape_cast %75 : vector<1x1x4x12xf32> to vector<4x12xf32>
    %77 = vector.extract_strided_slice %65 {offsets = [0, 2], sizes = [12, 16], strides = [1, 1]} : vector<12x128xf32> to vector<12x16xf32>
    %cst_73 = arith.constant dense<0.000000e+00> : vector<4x16xf32>
    %78 = tpu.matmul %76, %77, %cst_73 {dimension_numbers = #tpu.dot_dimension_numbers<[1], [0], [0], [1], [0, 0, 1, 1], [], []>} : vector<4x12xf32>, vector<12x16xf32>, vector<4x16xf32> -> vector<4x16xf32>
    %79 = arith.addf %74, %78 : vector<4x16xf32>
    %c2_74 = arith.constant 2 : index
    %c0_75 = arith.constant 0 : index
    %c0_76 = arith.constant 0 : index
    %80 = vector.load %arg3[%c2_74, %c0_75, %c0_76] : memref<3x4x1xf32, #tpu.memory_space<vmem>>, vector<1x4x1xf32>
    %81 = vector.shape_cast %80 : vector<1x4x1xf32> to vector<4x1xf32>
    %82 = vector.broadcast %81 : vector<4x1xf32> to vector<4x16xf32>
    %83 = arith.addf %79, %82 : vector<4x16xf32>
    %cst_77 = arith.constant 0.000000e+00 : f32
    %84 = vector.broadcast %cst_77 : f32 to vector<4x16xf32>
    %85 = arith.maximumf %83, %84 : vector<4x16xf32>
    %cst_78 = arith.constant 0.000000e+00 : f32
    %86 = vector.broadcast %cst_78 : f32 to vector<4x1xf32>
    %cst_79 = arith.constant 0.000000e+00 : f32
    %87 = vector.broadcast %cst_79 : f32 to vector<4x111xf32>
    %88 = tpu.concatenate %86, %85, %87 in 1 : vector<4x1xf32>, vector<4x16xf32>, vector<4x111xf32> -> vector<4x128xf32>
    %c0_80 = arith.constant 0 : index
    %c12 = arith.constant 12 : index
    %c0_81 = arith.constant 0 : index
    %89 = vector.load %arg4[%c0_80, %c12, %c0_81] : memref<1x16x128xf32, #tpu.memory_space<vmem>>, vector<1x4x128xf32>
    %90 = vector.shape_cast %89 : vector<1x4x128xf32> to vector<4x128xf32>
    %91 = vector.shape_cast %88 : vector<4x128xf32> to vector<1x4x128xf32>
    tpu.vector_store %arg4[%c0_80, %c12, %c0_81], %91 {strides = array<i32>} : memref<1x16x128xf32, #tpu.memory_space<vmem>>, vector<1x4x128xf32>,
    return
  }
  func.func @transform_0(%arg0: i32) -> (i32, i32, i32) {
    %c0_i32 = arith.constant 0 : i32
    %c0_i32_0 = arith.constant 0 : i32
    %c0_i32_1 = arith.constant 0 : i32
    return %arg0, %c0_i32, %c0_i32_0 : i32, i32, i32
  }
  func.func @transform_1(%arg0: i32) -> (i32, i32, i32, i32) {
    %c0_i32 = arith.constant 0 : i32
    %c0_i32_0 = arith.constant 0 : i32
    %c0_i32_1 = arith.constant 0 : i32
    %c0_i32_2 = arith.constant 0 : i32
    %c0_i32_3 = arith.constant 0 : i32
    return %c0_i32, %c0_i32_0, %c0_i32_1, %c0_i32_2 : i32, i32, i32, i32
  }
  func.func @transform_2(%arg0: i32) -> (i32, i32, i32) {
    %c0_i32 = arith.constant 0 : i32
    %c0_i32_0 = arith.constant 0 : i32
    %c0_i32_1 = arith.constant 0 : i32
    %c0_i32_2 = arith.constant 0 : i32
    return %c0_i32, %c0_i32_0, %c0_i32_1 : i32, i32, i32
  }
  func.func @transform_3(%arg0: i32) -> (i32, i32, i32) {
    %c0_i32 = arith.constant 0 : i32
    %c0_i32_0 = arith.constant 0 : i32
    %c0_i32_1 = arith.constant 0 : i32
    return %arg0, %c0_i32, %c0_i32_0 : i32, i32, i32
  }
}

</mosaic_0001>

<bundles_post_ra>
// kernel: dense_block_pallas.1
= control target key start
LH: loop header
LB: loop body
LE: loop exit
PB: predicated region body
PF: predicated region fallthrough
CT: control target
= control target key end

     0   :  { %s1185_s12 = smov 0   ;;  %s1312_s0 = inlined_call_operand.vmem [shape: f32[2,4,16], index: 0, kind: input, shape index: {}]   ;;  %s1313_s1 = inlined_call_operand.vmem [shape: f32[3,3,4,12], index: 1, kind: input, shape index: {}]   ;;  %s1314_s2 = inlined_call_operand.vmem [shape: f32[3,4,1], index: 2, kind: input, shape index: {}]   ;;  %s1315_s3 = inlined_call_operand.vmem [shape: f32[2,16,128], index: 3, kind: output, shape index: {}]  }
   0x1 LB: > { %s1001_s13 = sadd.s32 4294967295, %s1155_s12   ;;  %p1005_p0 = scmp.ge.s32.totalorder %s1155_s12, 1  ;;  %s1155_s12 = sphi %s1185_s12, %s13_s12  }
   0x2   : > { %p136_p1 = scmp.lt.s32.totalorder %s1155_s12, 3 }
   0x4   : > { %p137_p2 = pnand %p1005_p0, %p136_p1 }
   0x5   : > { %p159_p3 = scmp.lt.s32.totalorder (!%p137_p2), %s1001_s13, 1  ;;  %v1157_v0 = vmov (!%p137_p2), 0.0   ;;  %s1158_s18 = smov (!%p137_p2), 1   ;;  %vm173_vm0 = vcmask (!%p137_p2), 7168   ;;  %vm175_vm1 = vcmask (!%p137_p2), 138240   ;;  %vm1159_vm2 = vmmov (!%p137_p2), 0  }
   0x6   : > { %140 = sbr.rel (%p137_p2) target bundleno = 1532 (0x5fc), region = 32  ;;  %1063 = vmatprep.subr.mxu1 (!%p137_p2), %v1157_v0  ;;  %1058 = vmatprep.subr.mxu0 (!%p137_p2), %v1157_v0  ;;  %v1160_v5 = vmov (!%p137_p2), 0   ;;  %vm189_vm3 = vcmask (!%p137_p2), 1043456   ;;  %vm185_vm4 = vcmask (!%p137_p2), 31744   ;;  %v179_v7 = vld [vmem:[%s1313_s1] sm:$0xf] (!%p137_p2) }
   0x7   : > { %1060 = vmatprep.mubr.msk.f32.mxu0 (!%p137_p2), %vm1159_vm2, %v1157_v0  ;;  %1065 = vmatprep.mubr.msk.f32.mxu1 (!%p137_p2), %vm1159_vm2, %v1157_v0  ;;  %s1161_s25 = smov (!%p137_p2), 126   ;;  %s1162_s26 = smov (!%p137_p2), 127   ;;  %v417_v8 = vld [vmem:[%s1314_s2] sm:$0xf] (!%p137_p2)  ;;  %v1009_v9 = vld [vmem:[%s1313_s1 + $0x4] sm:$0xf] (!%p137_p2) }
   0x8   : > { %1137 = vset.pattern.permute.xlu1 (!%p137_p2), %v1160_v5  ;;  %1148 = vset.pattern.permute.xlu0 (!%p137_p2), %v1160_v5  ;;  %v1014_v12 = vld [vmem:[%s1313_s1 + $0x8] sm:$0xf] (!%p137_p2)  ;;  %vm441_vm5 = vcmask (!%p137_p2), 64512   ;;  %v1017_v28 = vld [vmem:[%s1313_s1 + $0xc] sm:$0xf] (!%p137_p2)  ;;  %v1163_v39 = vmov (!%p137_p2), 0.0|0.0  }
   0x9   : > { %v1023_v29 = vld [vmem:[%s1314_s2 + $0x4] sm:$0xf] (!%p137_p2)  ;;  %v1018_v30 = vld [vmem:[%s1313_s1 + $0x10] sm:$0xf] (!%p137_p2)  ;;  %v1021_v33 = vld [vmem:[%s1313_s1 + $0x14] sm:$0xf] (!%p137_p2) }
   0xa   : > { %vm1164_vm6 = vmmov (!%p137_p2), 1   ;;  %v1033_v53 = vld [vmem:[%s1314_s2 + $0x8] sm:$0xf] (!%p137_p2)  ;;  %vm696_vm8 = vcmask (!%p137_p2), 97280   ;;  %v1024_v54 = vld [vmem:[%s1313_s1 + $0x18] sm:$0xf] (!%p137_p2) }
   0xb   : > { %vm1276_vm7 = vmpackc.low (!%p137_p2), %vm189_vm3, %vm1164_vm6  ;;  %v1025_v62 = vld [vmem:[%s1313_s1 + $0x1c] sm:$0xf] (!%p137_p2) }
   0xd   : > { %s1319_s13 = smov (!%p159_p3, %s1001_s13), 1 }
   0xe   : > { %s1006_s14 = sshll.u32 %s1319_s13, 2  ;;  %s1036_s19 = sshll.u32 %s1319_s13, 4 }
   0xf   : > { %s162_s17 = scalar_lea.vmem %s1312_s0, %s1006_s14  ;;  %s1206_s22 = scalar_lea.vmem %s1315_s3, %s1036_s19 }
  0x10   : > { %v168_v1 = vld [vmem:[%s162_s17] sm:$0xf] }
  0x11   : > { %170 = vrot.lane.b32.xlu0 %v168_v1, %s1158_s18  ;;  %v1030_v1 = vld [vmem:[%s1313_s1 + $0x20] sm:$0xf] }
  0x83   : > { %v171_v2 = vpop.permute.xlu0 %170 }
  0x84   : > { %v174_v3 = vsel %vm173_vm0, 0.0, %v171_v2 }
  0x85   : > { %v176_v4 = vsel %vm175_vm1, %v174_v3, 0.0 }
  0x86   : > { %177 = vst [vmem:[%s1206_s22] sm:$0xf] %v176_v4 }
  0x8d   : > { %v178_v6 = vld [vmem:[%s1206_s22] sm:$0xf] }
  0x8e   : > { %339 = vrot.lane.b32.xlu1 %v178_v6, %s1161_s25  ;;  %183 = vrot.lane.b32.xlu0 %v178_v6, %s1162_s26 }
  0x8f   : > { %1064 = vmatpush3.msk.msra.mxu1 %vm189_vm3, %v178_v6 }
  0x90   : > { %1066 = vmatmul.mubr.msk.f32.vlgmr.msra.gmra.mrb[0].mxu1 %vm185_vm4, %v179_v7  ;;  %1073 = vmatprep.subr.mxu1 %v1157_v0 }
  0x91   : > { %1075 = vmatprep.mubr.msk.f32.mxu1 %vm1159_vm2, %v1157_v0 }
  0x92   : > { %420 = vperm.xlu1 %1137, %v417_v8  }
 0x100   : > { %v184_v10 = vpop.permute.xlu0 %183  ;;  %v340_v11 = vpop.permute.xlu1 %339 }
 0x101   : > { %1059 = vmatpush3.msk.msra.mxu0 %vm189_vm3, %v184_v10 }
 0x102   : > { %1061 = vmatmul.mubr.msk.f32.vlgmr.msra.gmra.mrb[0].mxu0 %vm185_vm4, %v1009_v9  ;;  %1068 = vmatprep.subr.mxu0 %v1157_v0 }
 0x103   : > { %1069 = vmatpush3.msk.msra.mxu0 %vm189_vm3, %v340_v11  ;;  %1070 = vmatprep.mubr.msk.f32.mxu0 %vm1159_vm2, %v1157_v0 }
 0x104   : > { %1078 = vmatprep.subr.mxu0 %v1157_v0 }
 0x106   : > { %1071 = vmatmul.mubr.msk.f32.vlgmr.msra.gmra.mrb[2].mxu0 %vm185_vm4, %v1014_v12 }
 0x107   : > { %1080 = vmatprep.mubr.msk.f32.mxu0 %vm1159_vm2, %v1157_v0 }
 0x111   : > { %v421_v19 = vpop.permute.xlu1 %420 }
 0x163   : > { %v333_v13 = vpop.f32.mrb[0].mxu1 }
 0x164   : > { %v1067_v14 = vpop.f32.mrb[1].mxu1 }
 0x1d5   : > { %v258_v15 = vpop.f32.mrb[0].mxu0 }
 0x1d6   : > { %v334_v16 = vadd.f32 %v333_v13, %v258_v15  ;;  %v1062_v17 = vpop.f32.mrb[1].mxu0 }
 0x1d9   : > { %v412_v18 = vpop.f32.mrb[2].mxu0 }
 0x1da   : > { %v416_v20 = vadd.f32 %v412_v18, %v334_v16  ;;  %v1072_v21 = vpop.f32.mrb[3].mxu0 }
 0x1dc   : > { %v423_v22 = vadd.f32 %v421_v19, %v416_v20 }
 0x1de   : > { %v424_v23 = vmax.f32 %v423_v22, 0.0 }
 0x1e0   : > { %426 = vrot.lane.b32.xlu0 %v424_v23, %s1158_s18 }
 0x252   : > { %v427_v24 = vpop.permute.xlu0 %426 }
 0x253   : > { %v429_v25 = vsel %vm173_vm0, 0.0, %v427_v24 }
 0x254   : > { %v430_v26 = vsel %vm175_vm1, %v429_v25, 0.0 }
 0x255   : > { %431 = vst [vmem:[%s1206_s22 + $0x4] sm:$0xf] %v430_v26 }
 0x25c   : > { %v432_v27 = vld [vmem:[%s1206_s22] sm:$0xff] }
 0x25d   : > { %590 = vrot.lane.b32.xlu0 %v432_v27, %s1161_s25  ;;  %438 = vrot.lane.b32.xlu1 %v432_v27, %s1162_s26 }
 0x25e   : > { %1079 = vmatpush3.msra.mxu0 %v432_v27 }
 0x25f   : > { %1081 = vmatmul.mubr.msk.f32.vlgmr.msra.gmra.mrb[4].mxu0 %vm441_vm5, %v1017_v28  ;;  %1109 = vmatprep.subr.bf16.mxu0 %v1163_v39 }
 0x260   : > { %1092 = vmatprep.mubr.msk.f32.mxu0 %vm1159_vm2, %v1157_v0 }
 0x261   : > { %671 = vperm.xlu1 %1137, %v1023_v29  }
 0x2cf   : > { %v439_v31 = vpop.permute.xlu1 %438  ;;  %v591_v32 = vpop.permute.xlu0 %590 }
 0x2d0   : > { %1074 = vmatpush3.msra.mxu1 %v439_v31 }
 0x2d1   : > { %1076 = vmatmul.mubr.msk.f32.vlgmr.msra.gmra.mrb[2].mxu1 %vm441_vm5, %v1018_v30  ;;  %1083 = vmatprep.subr.mxu1 %v1157_v0 }
 0x2d2   : > { %1084 = vmatpush3.msra.mxu1 %v591_v32  ;;  %1085 = vmatprep.mubr.msk.f32.mxu1 %vm1159_vm2, %v1157_v0 }
 0x2d3   : > { %1113 = vmatprep.subr.bf16.mxu1 %v1163_v39 }
 0x2d5   : > { %1086 = vmatmul.mubr.msk.f32.vlgmr.msra.gmra.mrb[4].mxu1 %vm441_vm5, %v1021_v33 }
 0x2d6   : > { %1099 = vmatprep.mubr.msk.f32.mxu1 %vm1159_vm2, %v1157_v0 }
 0x2e0   : > { %v672_v43 = vpop.permute.xlu1 %671 }
 0x332   : > { %v584_v34 = vpop.f32.mrb[4].mxu0 }
 0x333   : > { %v1082_v35 = vpop.f32.mrb[5].mxu0 }
 0x3a4   : > { %v511_v36 = vpop.f32.mrb[2].mxu1 }
 0x3a5   : > { %v1077_v37 = vpop.f32.mrb[3].mxu1  ;;  %v585_v38 = vadd.f32 %v584_v34, %v511_v36 }
 0x3a8   : > { %v662_v40 = vpop.f32.mrb[4].mxu1 }
 0x3a9   : > { %v666_v41 = vadd.f32 %v662_v40, %v585_v38  ;;  %v1087_v42 = vpop.f32.mrb[5].mxu1 }
 0x3ab   : > { %v674_v44 = vadd.f32 %v672_v43, %v666_v41 }
 0x3ad   : > { %v675_v45 = vmax.f32 %v674_v44, 0.0 }
 0x3af   : > { %677 = vrot.lane.b32.xlu0 %v675_v45, %s1158_s18 }
 0x421   : > { %v678_v46 = vpop.permute.xlu0 %677 }
 0x422   : > { %v680_v47 = vsel %vm173_vm0, 0.0, %v678_v46 }
 0x423   : > { %v681_v48 = vsel %vm175_vm1, %v680_v47, 0.0 }
 0x424   : > { %682 = vst [vmem:[%s1206_s22 + $0x8] sm:$0xf] %v681_v48 }
 0x42b   : > { %v684_v49 = vld [vmem:[%s1206_s22 + $0x8] sm:$0xf] }
 0x42c   : > { %v1143_v50 = vpack.i.bf16 %v684_v49, %v432_v27  ;;  %v1114_v51 = vpack.c.bf16 %v684_v49, %v432_v27 }
 0x42e   : > { %1144 = vrot.lane.b32.xlu0 %v1143_v50, %s1161_s25  ;;  %1139 = vrot.lane.b32.xlu1 %v1143_v50, %s1162_s26 }
 0x42f   : > { %1116 = vmatpush3.bf16.msk.msra.mxu1 %vm1276_vm7, %v1114_v51 }
 0x432   : > { %934 = vperm.xlu1 %1137, %v1033_v53   ;;  %1100 = vmatmul.mubr.msk.f32.vlgmr.msra.gmra.mrb[6].mxu1 %vm696_vm8, %v1024_v54 }
 0x4a0   : > { %v1145_v55 = vpop.permute.xlu0 %1144  ;;  %v1140_v56 = vpop.permute.xlu1 %1139 }
 0x4a1   : > { %v1142_v57 = vunpack.i.h.bf16 %v1140_v56  ;;  %v1141_v58 = vunpack.i.l.bf16 %v1140_v56  ;;  %v1147_v59 = vunpack.i.h.bf16 %v1145_v55  ;;  %v1146_v60 = vunpack.i.l.bf16 %v1145_v55 }
 0x4a3   : > { %v1110_v61 = vpack.c.bf16 %v1142_v57, %v1141_v58  ;;  %v1118_v63 = vpack.c.bf16 %v1147_v59, %v1146_v60 }
 0x4a5   : > { %1112 = vmatpush3.bf16.msk.msra.mxu0 %vm1276_vm7, %v1110_v61 }
 0x4a6   : > { %1117 = vmatprep.subr.bf16.mxu0 %v1163_v39 }
 0x4a8   : > { %1093 = vmatmul.mubr.msk.f32.vlgmr.msra.gmra.mrb[6].mxu0 %vm696_vm8, %v1025_v62 }
 0x4a9   : > { %1120 = vmatpush3.bf16.msk.msra.mxu0 %vm1276_vm7, %v1118_v63  ;;  %1106 = vmatprep.mubr.msk.f32.mxu0 %vm1159_vm2, %v1157_v0 }
 0x4ac   : > { %1107 = vmatmul.mubr.msk.f32.vlgmr.msra.gmra.mrb[8].mxu0 %vm696_vm8, %v1030_v1 }
 0x4b1   : > { %v935_v10 = vpop.permute.xlu1 %934 }
 0x505   : > { %v843_v2 = vpop.f32.mrb[6].mxu1 }
 0x506   : > { %v1101_v3 = vpop.f32.mrb[7].mxu1 }
 0x57b   : > { %v768_v4 = vpop.f32.mrb[6].mxu0 }
 0x57c   : > { %v844_v5 = vadd.f32 %v843_v2, %v768_v4  ;;  %v1094_v6 = vpop.f32.mrb[7].mxu0 }
 0x57f   : > { %v925_v7 = vpop.f32.mrb[8].mxu0 }
 0x580   : > { %v929_v8 = vadd.f32 %v925_v7, %v844_v5  ;;  %v1108_v9 = vpop.f32.mrb[9].mxu0 }
 0x582   : > { %v937_v11 = vadd.f32 %v935_v10, %v929_v8 }
 0x584   : > { %v938_v12 = vmax.f32 %v937_v11, 0.0 }
 0x586   : > { %940 = vrot.lane.b32.xlu0 %v938_v12, %s1158_s18 }
 0x5f8   : > { %v941_v0 = vpop.permute.xlu0 %940 }
 0x5f9   : > { %v943_v13 = vsel %vm173_vm0, 0.0, %v941_v0 }
 0x5fa   : > { %v944_v14 = vsel %vm175_vm1, %v943_v13, 0.0 }
 0x5fb   : > { %945 = vst [vmem:[%s1206_s22 + $0xc] sm:$0xf] %v944_v14 }
 0x5fc PF: > { %s13_s12 = sadd.s32 1, %s1155_s12  }
 0x5fd   : > { %p10_p4 = scmp.ge.s32.totalorder %s13_s12, 4  }
 0x5ff   :  { %12 = sbr.rel (!%p10_p4) target bundleno = 1 (0x1), region = 72 }

</bundles_post_ra>
